<compile_context>
chip_gen: v6e
topology: v6e:2x2x1
jax: 0.10.0
libtpu: 0.0.40
codegen_flags: <defaults>
</compile_context>

<pallas_src>
import functools

import jax
import jax.numpy as jnp
from jax import lax
from jax.experimental import pallas as pl
from jax.experimental.pallas import tpu as pltpu

IN_SIZE = 85
HIDDEN_SIZE = 128
N_HIDDEN = 3
B_INIT = -0.2


def mlp_kernel(x_ref,
               w0_ref, b0_ref,
               w1_ref, b1_ref,
               w2_ref, b2_ref,
               wp_ref, bp_ref,
               o_ref):
    """Whole forward pass for one batch tile, entirely in VMEM.

    x_ref : (bm, 85)   float32, batch-major straight from HBM
    wK_ref: (128, in)  compute dtype, PyTorch (out, in) layout
    bK_ref: (128, 1)   float32
    wp_ref: (1, 128)   compute dtype
    bp_ref: (1, 1)     float32
    o_ref : (1, bm)    float32  (lane-dense output block, batch in lanes)
    """
    cd = w0_ref.dtype

    # fc0 + ReLU.  NT matmul contracting the feature dims:
    #   (128, 85) . (bm, 85)^T -> (128, bm) feature-major, f32 accumulation.
    # MXU masks the K=85 contraction; no host-side feature padding needed.
    x = x_ref[...].astype(cd)
    h = lax.dot_general(w0_ref[...], x, (((1,), (1,)), ((), ())),
                        preferred_element_type=jnp.float32)
    h = jnp.maximum(h + b0_ref[...], 0.0)

    # fc1 + ReLU: (128,128) @ (128,bm) -> (128,bm)
    h = jnp.dot(w1_ref[...], h.astype(cd), preferred_element_type=jnp.float32)
    h = jnp.maximum(h + b1_ref[...], 0.0)

    # fc2 + ReLU
    h = jnp.dot(w2_ref[...], h.astype(cd), preferred_element_type=jnp.float32)
    h = jnp.maximum(h + b2_ref[...], 0.0)

    # predict (no activation): (1,128) @ (128,bm) -> (1,bm), lane-dense store
    out = jnp.dot(wp_ref[...], h.astype(cd), preferred_element_type=jnp.float32)
    o_ref[...] = (out + bp_ref[...]).astype(o_ref.dtype)


def _round_up(a, m):
    return (a + m - 1) // m * m


@functools.partial(jax.jit, static_argnames=("bm", "compute_dtype"))
def neural_net_forward(x, params, *, bm=1024, compute_dtype=jnp.bfloat16):
    """Run the MLP forward via a single pallas_call tiled over the batch.

    x: (B, 85) float32 (PyTorch convention).  Returns (B, 1) float32.
    `bm` is the requested batch tile (multiple of 128; sweep 1024-4096 at
    very large B).
    """
    assert bm % 128 == 0 and bm >= 128, "bm must be a multiple of 128"
    (w0, b0), (w1, b1), (w2, b2), (wp, bp) = params   # PyTorch (out, in) layout
    H = HIDDEN_SIZE
    B = x.shape[0]
    assert x.shape[1] == IN_SIZE

    # ---- batch tile selection ----
    b128 = _round_up(B, 128)
    bm_eff = max(128, _round_up(min(bm, b128), 128))
    # v7x has 2 TensorCores and the "parallel" batch axis is the only thing
    # sharding work across them: keep >= 2 tiles whenever the batch allows.
    if b128 > 128 and bm_eff >= b128:
        bm_eff = max(128, _round_up(b128 // 2, 128))
    n_tiles = pl.cdiv(B, bm_eff)

    # ---- weights / biases (tiny; stay resident in VMEM across the grid) ----
    w0c = w0.astype(compute_dtype)                     # (128, 85)
    w1c = w1.astype(compute_dtype)                     # (128, 128)
    w2c = w2.astype(compute_dtype)                     # (128, 128)
    wpc = wp.astype(compute_dtype)                     # (1, 128)
    b0c = b0.reshape(H, 1).astype(jnp.float32)
    b1c = b1.reshape(H, 1).astype(jnp.float32)
    b2c = b2.reshape(H, 1).astype(jnp.float32)
    bpc = bp.reshape(1, 1).astype(jnp.float32)

    itemsize = jnp.dtype(compute_dtype).itemsize
    const_bytes = ((w0c.size + w1c.size + w2c.size + wpc.size) * itemsize
                   + (3 * H + 1) * 4)
    flops = 2 * n_tiles * bm_eff * (IN_SIZE * H + (N_HIDDEN - 1) * H * H + H)
    bytes_accessed = B * IN_SIZE * 4 + B * 4 + const_bytes

    # VMEM working-set estimate: double-buffered x tile + a few (128, bm) f32
    # temporaries + resident weights.  Raise the scoped limit only when we
    # would crowd v5e's 16 MiB scoped default (bm >= ~2048).
    vmem_est = (2 * bm_eff * IN_SIZE * 4
                + 6 * H * bm_eff * 4
                + 2 * bm_eff * 4
                + 2 * const_bytes)
    cp_kwargs = dict(dimension_semantics=("parallel",))
    if vmem_est > 12 * 1024 * 1024:
        cp_kwargs["vmem_limit_bytes"] = int(min(2 * vmem_est, 48 * 1024 * 1024))

    def const_spec(shape):
        # full-array block, constant block index -> fetched once, stays in VMEM
        return pl.BlockSpec(shape, lambda i: (0, 0))

    out2d = pl.pallas_call(
        mlp_kernel,
        out_shape=jax.ShapeDtypeStruct((1, B), jnp.float32),
        grid_spec=pltpu.PrefetchScalarGridSpec(
            num_scalar_prefetch=0,
            grid=(n_tiles,),
            in_specs=[
                pl.BlockSpec((bm_eff, IN_SIZE), lambda i: (i, 0)),  # x, streamed
                const_spec((H, IN_SIZE)), const_spec((H, 1)),       # w0, b0
                const_spec((H, H)),       const_spec((H, 1)),       # w1, b1
                const_spec((H, H)),       const_spec((H, 1)),       # w2, b2
                const_spec((1, H)),       const_spec((1, 1)),       # wp, bp
            ],
            out_specs=pl.BlockSpec((1, bm_eff), lambda i: (0, i)),  # lane-dense
        ),
        compiler_params=pltpu.CompilerParams(**cp_kwargs),
        cost_estimate=pl.CostEstimate(
            flops=flops, transcendentals=0, bytes_accessed=bytes_accessed),
    )(x, w0c, b0c, w1c, b1c, w2c, b2c, wpc, bpc)

    return out2d.reshape(B, 1)


def init_params(key):
    """Deterministic init matching the module: weight ~ N(0, 0.1), bias = -0.2.

    Weights kept in PyTorch nn.Linear layout: (out_features, in_features).
    """
    layer_dims = ([(HIDDEN_SIZE, IN_SIZE)]
                  + [(HIDDEN_SIZE, HIDDEN_SIZE)] * (N_HIDDEN - 1)
                  + [(1, HIDDEN_SIZE)])
    params = []
    for (fan_out, fan_in) in layer_dims:
        key, wk = jax.random.split(key)
        w = 0.1 * jax.random.normal(wk, (fan_out, fan_in), dtype=jnp.float32)
        b = jnp.full((fan_out,), B_INIT, dtype=jnp.float32)
        params.append((w, b))
    return params


def reference_forward(x, params, compute_dtype=jnp.float32):
    """Plain-JAX reference (y = x @ W^T + b), optionally with bf16 matmul
    inputs and f32 accumulation to match the kernel's numerics."""
    h = x
    for (w, b) in params[:-1]:
        pre = jnp.dot(h.astype(compute_dtype), w.T.astype(compute_dtype),
                      preferred_element_type=jnp.float32) + b
        h = jnp.maximum(pre, 0.0)
    wp, bp = params[-1]
    return jnp.dot(h.astype(compute_dtype), wp.T.astype(compute_dtype),
                   preferred_element_type=jnp.float32) + bp


# TODO(synk): batch_normalization=True branch (nn.BatchNorm1d) not implemented;
# the module default (and this kernel) is batch_normalization=False.

if __name__ == "__main__":
    key = jax.random.PRNGKey(0)
    key, xk = jax.random.split(key)

    # Small-but-nontrivial batch: not a multiple of the tile (exercises the
    # masked edge block) and > 128 (exercises the 2-tile parallel grid axis).
    B = 300
    x = jax.random.normal(xk, (B, IN_SIZE), dtype=jnp.float32)

    params = init_params(key)

    out = neural_net_forward(x, params)      # bm=1024 default (effective 256 here)
    out = jax.block_until_ready(out)
    assert out.shape == (B, 1)

    # Check against a numerics-matched reference (bf16 matmul inputs, f32
    # accumulation).  Tolerance slightly loosened: MXU vs XLA accumulation
    # order may differ.
    ref_match = reference_forward(x, params, compute_dtype=jnp.bfloat16)
    assert jnp.allclose(out, ref_match, atol=5e-3, rtol=5e-3), \
        "mismatch vs matched-precision reference"

    # Loose sanity check against the full-f32 reference (bf16 rounding error
    # for this net is ~1e-2; bound intentionally generous).
    ref_f32 = reference_forward(x, params, compute_dtype=jnp.float32)
    assert float(jnp.max(jnp.abs(out - ref_f32))) < 0.3, \
        "bf16 kernel deviates too far from f32 reference"

    print("KERNEL_OK")
</pallas_src>

<mosaic_0001>
module attributes {stable_mosaic.version = 11 : i64} {
  func.func @mlp_kernel(%arg0: i32, %arg1: memref<256x85xf32, #tpu.memory_space<vmem>>, %arg2: memref<128x85xbf16, #tpu.memory_space<vmem>>, %arg3: memref<128x1xf32, #tpu.memory_space<vmem>>, %arg4: memref<128x128xbf16, #tpu.memory_space<vmem>>, %arg5: memref<128x1xf32, #tpu.memory_space<vmem>>, %arg6: memref<128x128xbf16, #tpu.memory_space<vmem>>, %arg7: memref<128x1xf32, #tpu.memory_space<vmem>>, %arg8: memref<1x128xbf16, #tpu.memory_space<vmem>>, %arg9: memref<1x1xf32, #tpu.memory_space<vmem>>, %arg10: memref<1x256xf32, #tpu.memory_space<vmem>>) attributes {dimension_semantics = [#tpu.dimension_semantics<parallel>], iteration_bounds = array<i64: 2>, scalar_prefetch = 0 : i64, scratch_operands = 0 : i64, tpu.core_type = #tpu.core_type<tc>, window_params = [{transform_indices = @transform_0, window_bounds = array<i64: 256, 85>}, {pipeline_mode = #tpu.pipeline_mode<synchronous>, transform_indices = @transform_1, window_bounds = array<i64: 128, 85>}, {pipeline_mode = #tpu.pipeline_mode<synchronous>, transform_indices = @transform_2, window_bounds = array<i64: 128, 1>}, {pipeline_mode = #tpu.pipeline_mode<synchronous>, transform_indices = @transform_3, window_bounds = array<i64: 128, 128>}, {pipeline_mode = #tpu.pipeline_mode<synchronous>, transform_indices = @transform_4, window_bounds = array<i64: 128, 1>}, {pipeline_mode = #tpu.pipeline_mode<synchronous>, transform_indices = @transform_5, window_bounds = array<i64: 128, 128>}, {pipeline_mode = #tpu.pipeline_mode<synchronous>, transform_indices = @transform_6, window_bounds = array<i64: 128, 1>}, {pipeline_mode = #tpu.pipeline_mode<synchronous>, transform_indices = @transform_7, window_bounds = array<i64: 1, 128>}, {pipeline_mode = #tpu.pipeline_mode<synchronous>, transform_indices = @transform_8, window_bounds = array<i64: 1, 1>}, {transform_indices = @transform_9, window_bounds = array<i64: 1, 256>}]} {
    %c0 = arith.constant 0 : index
    %c0_0 = arith.constant 0 : index
    %0 = vector.load %arg1[%c0, %c0_0] : memref<256x85xf32, #tpu.memory_space<vmem>>, vector<256x85xf32>
    %1 = arith.truncf %0 : vector<256x85xf32> to vector<256x85xbf16>
    %c0_1 = arith.constant 0 : index
    %c0_2 = arith.constant 0 : index
    %2 = vector.load %arg2[%c0_1, %c0_2] : memref<128x85xbf16, #tpu.memory_space<vmem>>, vector<128x85xbf16>
    %cst = arith.constant dense<0.000000e+00> : vector<128x256xf32>
    %3 = tpu.matmul %2, %1, %cst {dimension_numbers = #tpu.dot_dimension_numbers<[1], [1], [0], [0], [0, 0, 1, 0], [], []>} : vector<128x85xbf16>, vector<256x85xbf16>, vector<128x256xf32> -> vector<128x256xf32>
    %c0_3 = arith.constant 0 : index
    %c0_4 = arith.constant 0 : index
    %4 = vector.load %arg3[%c0_3, %c0_4] : memref<128x1xf32, #tpu.memory_space<vmem>>, vector<128x1xf32>
    %5 = vector.broadcast %4 : vector<128x1xf32> to vector<128x256xf32>
    %6 = arith.addf %3, %5 : vector<128x256xf32>
    %cst_5 = arith.constant 0.000000e+00 : f32
    %7 = vector.broadcast %cst_5 : f32 to vector<128x256xf32>
    %8 = arith.maximumf %6, %7 : vector<128x256xf32>
    %c0_6 = arith.constant 0 : index
    %c0_7 = arith.constant 0 : index
    %9 = vector.load %arg4[%c0_6, %c0_7] : memref<128x128xbf16, #tpu.memory_space<vmem>>, vector<128x128xbf16>
    %10 = arith.truncf %8 : vector<128x256xf32> to vector<128x256xbf16>
    %cst_8 = arith.constant dense<0.000000e+00> : vector<128x256xf32>
    %11 = tpu.matmul %9, %10, %cst_8 {dimension_numbers = #tpu.dot_dimension_numbers<[1], [0], [0], [1], [0, 0, 1, 1], [], []>} : vector<128x128xbf16>, vector<128x256xbf16>, vector<128x256xf32> -> vector<128x256xf32>
    %c0_9 = arith.constant 0 : index
    %c0_10 = arith.constant 0 : index
    %12 = vector.load %arg5[%c0_9, %c0_10] : memref<128x1xf32, #tpu.memory_space<vmem>>, vector<128x1xf32>
    %13 = vector.broadcast %12 : vector<128x1xf32> to vector<128x256xf32>
    %14 = arith.addf %11, %13 : vector<128x256xf32>
    %cst_11 = arith.constant 0.000000e+00 : f32
    %15 = vector.broadcast %cst_11 : f32 to vector<128x256xf32>
    %16 = arith.maximumf %14, %15 : vector<128x256xf32>
    %c0_12 = arith.constant 0 : index
    %c0_13 = arith.constant 0 : index
    %17 = vector.load %arg6[%c0_12, %c0_13] : memref<128x128xbf16, #tpu.memory_space<vmem>>, vector<128x128xbf16>
    %18 = arith.truncf %16 : vector<128x256xf32> to vector<128x256xbf16>
    %cst_14 = arith.constant dense<0.000000e+00> : vector<128x256xf32>
    %19 = tpu.matmul %17, %18, %cst_14 {dimension_numbers = #tpu.dot_dimension_numbers<[1], [0], [0], [1], [0, 0, 1, 1], [], []>} : vector<128x128xbf16>, vector<128x256xbf16>, vector<128x256xf32> -> vector<128x256xf32>
    %c0_15 = arith.constant 0 : index
    %c0_16 = arith.constant 0 : index
    %20 = vector.load %arg7[%c0_15, %c0_16] : memref<128x1xf32, #tpu.memory_space<vmem>>, vector<128x1xf32>
    %21 = vector.broadcast %20 : vector<128x1xf32> to vector<128x256xf32>
    %22 = arith.addf %19, %21 : vector<128x256xf32>
    %cst_17 = arith.constant 0.000000e+00 : f32
    %23 = vector.broadcast %cst_17 : f32 to vector<128x256xf32>
    %24 = arith.maximumf %22, %23 : vector<128x256xf32>
    %c0_18 = arith.constant 0 : index
    %c0_19 = arith.constant 0 : index
    %25 = vector.load %arg8[%c0_18, %c0_19] : memref<1x128xbf16, #tpu.memory_space<vmem>>, vector<1x128xbf16>
    %26 = arith.truncf %24 : vector<128x256xf32> to vector<128x256xbf16>
    %cst_20 = arith.constant dense<0.000000e+00> : vector<1x256xf32>
    %27 = tpu.matmul %25, %26, %cst_20 {dimension_numbers = #tpu.dot_dimension_numbers<[1], [0], [0], [1], [0, 0, 1, 1], [], []>} : vector<1x128xbf16>, vector<128x256xbf16>, vector<1x256xf32> -> vector<1x256xf32>
    %c0_21 = arith.constant 0 : index
    %c0_22 = arith.constant 0 : index
    %28 = vector.load %arg9[%c0_21, %c0_22] : memref<1x1xf32, #tpu.memory_space<vmem>>, vector<1x1xf32>
    %29 = vector.broadcast %28 : vector<1x1xf32> to vector<1x256xf32>
    %30 = arith.addf %27, %29 : vector<1x256xf32>
    %c0_23 = arith.constant 0 : index
    %c0_24 = arith.constant 0 : index
    %31 = vector.load %arg10[%c0_23, %c0_24] : memref<1x256xf32, #tpu.memory_space<vmem>>, vector<1x256xf32>
    tpu.vector_store %arg10[%c0_23, %c0_24], %30 {strides = array<i32>} : memref<1x256xf32, #tpu.memory_space<vmem>>, vector<1x256xf32>,
    return
  }
  func.func @transform_0(%arg0: i32) -> (i32, i32) {
    %c0_i32 = arith.constant 0 : i32
    %c0_i32_0 = arith.constant 0 : i32
    return %arg0, %c0_i32 : i32, i32
  }
  func.func @transform_1(%arg0: i32) -> (i32, i32) {
    %c0_i32 = arith.constant 0 : i32
    %c0_i32_0 = arith.constant 0 : i32
    %c0_i32_1 = arith.constant 0 : i32
    return %c0_i32, %c0_i32_0 : i32, i32
  }
  func.func @transform_2(%arg0: i32) -> (i32, i32) {
    %c0_i32 = arith.constant 0 : i32
    %c0_i32_0 = arith.constant 0 : i32
    %c0_i32_1 = arith.constant 0 : i32
    return %c0_i32, %c0_i32_0 : i32, i32
  }
  func.func @transform_3(%arg0: i32) -> (i32, i32) {
    %c0_i32 = arith.constant 0 : i32
    %c0_i32_0 = arith.constant 0 : i32
    %c0_i32_1 = arith.constant 0 : i32
    return %c0_i32, %c0_i32_0 : i32, i32
  }
  func.func @transform_4(%arg0: i32) -> (i32, i32) {
    %c0_i32 = arith.constant 0 : i32
    %c0_i32_0 = arith.constant 0 : i32
    %c0_i32_1 = arith.constant 0 : i32
    return %c0_i32, %c0_i32_0 : i32, i32
  }
  func.func @transform_5(%arg0: i32) -> (i32, i32) {
    %c0_i32 = arith.constant 0 : i32
    %c0_i32_0 = arith.constant 0 : i32
    %c0_i32_1 = arith.constant 0 : i32
    return %c0_i32, %c0_i32_0 : i32, i32
  }
  func.func @transform_6(%arg0: i32) -> (i32, i32) {
    %c0_i32 = arith.constant 0 : i32
    %c0_i32_0 = arith.constant 0 : i32
    %c0_i32_1 = arith.constant 0 : i32
    return %c0_i32, %c0_i32_0 : i32, i32
  }
  func.func @transform_7(%arg0: i32) -> (i32, i32) {
    %c0_i32 = arith.constant 0 : i32
    %c0_i32_0 = arith.constant 0 : i32
    %c0_i32_1 = arith.constant 0 : i32
    return %c0_i32, %c0_i32_0 : i32, i32
  }
  func.func @transform_8(%arg0: i32) -> (i32, i32) {
    %c0_i32 = arith.constant 0 : i32
    %c0_i32_0 = arith.constant 0 : i32
    %c0_i32_1 = arith.constant 0 : i32
    return %c0_i32, %c0_i32_0 : i32, i32
  }
  func.func @transform_9(%arg0: i32) -> (i32, i32) {
    %c0_i32 = arith.constant 0 : i32
    %c0_i32_0 = arith.constant 0 : i32
    return %c0_i32, %arg0 : i32, i32
  }
}

</mosaic_0001>

<bundles_post_ra>
// kernel: neural_net_forward.1
= control target key start
LH: loop header
LB: loop body
LE: loop exit
PB: predicated region body
PF: predicated region fallthrough
CT: control target
= control target key end

     0   :  { %s2499_s0 = inlined_call_operand.vmem [shape: f32[300,85], index: 0, kind: input, shape index: {}]   ;;  %s2500_s1 = inlined_call_operand.vmem [shape: bf16[128,85], index: 1, kind: input, shape index: {}]   ;;  %s2501_s2 = inlined_call_operand.vmem [shape: f32[128,1], index: 2, kind: input, shape index: {}]   ;;  %s2502_s3 = inlined_call_operand.vmem [shape: bf16[128,128], index: 3, kind: input, shape index: {}]   ;;  %s2503_s4 = inlined_call_operand.vmem [shape: f32[128,1], index: 4, kind: input, shape index: {}]   ;;  %s2504_s5 = inlined_call_operand.vmem [shape: bf16[128,128], index: 5, kind: input, shape index: {}]   ;;  %s2505_s6 = inlined_call_operand.vmem [shape: f32[128,1], index: 6, kind: input, shape index: {}]   ;;  %s2506_s7 = inlined_call_operand.vmem [shape: bf16[1,128], index: 7, kind: input, shape index: {}]   ;;  %s2507_s8 = inlined_call_operand.<no memory space> [shape: f32[1,1], index: 8, kind: input, shape index: {}]   ;;  %s2508_s9 = inlined_call_operand.hbm [shape: f32[1,300], index: 9, kind: output, shape index: {}]  }
   0x1   :  { %v14_v0 = vstv %s2507_s8 }
   0x2   :  { %15 = vst [vmem:[#allocation2] sm:$0x1] %v14_v0 }
   0x3   :  { %16 = vsyncpa [#allocation4], 0 }
   0x4   :  { %18 = vsyncpa [#allocation4 + $0x1], 0  ;;  %s1862_s11 = smov 0   ;;  %s1864_s12 = smov 0  }
   0x5   :  { %s1866_s13 = smov 0   ;;  %s1868_s14 = smov 0  }
   0x6 LB: > { %s1883_s8 = sadd.s32 4294967295, %s1804_s14   ;;  %s1591_s15 = sadd.s32 4294967294, %s1804_s14   ;;  %s1804_s14 = sphi %s1868_s14, %s2514_s14   ;;  %s1800_s13 = sphi %s1866_s13, %s2513_s13   ;;  %s1796_s12 = sphi %s1864_s12, %s2512_s12   ;;  %s1792_s11 = sphi %s1862_s11, %s2511_s11  }
   0x7   : > { %s1887_s16 = sadd.s32 1, %s1804_s14   ;;  %s225_s17 = sadd.s32 1, %s1800_s13 }
   0x8   : > { %s222_s18 = ssub.s32 %s1804_s14, %s1887_s16  ;;  %p235_p0 = scmp.ne.s32.totalorder %s1800_s13, %s1796_s12 }
   0x9   : > { %p223_p1 = scmp.eq.s32.totalorder %s222_s18, 0  ;;  %p236_p2 = scmp.eq.s32.totalorder %s1883_s8, 1 }
   0xa   : > { %p241_p3 = scmp.ne.s32.totalorder %s1796_s12, %s1792_s11  ;;  %p242_p4 = scmp.eq.s32.totalorder %s1591_s15, 1 }
   0xb   : > { %s1898_s19 = scalar_select %p223_p1, %s1800_s13, %s225_s17  }
   0xc   : > { %p1900_p5 = por %p236_p2, %p235_p0  ;;  %p1904_p6 = por %p242_p4, %p241_p3 }
   0xd   : > { %p1594_p7 = scmp.ge.s32.totalorder %s1804_s14, 1  ;;  %p301_p8 = scmp.lt.s32.totalorder %s1804_s14, 3 }
   0xf   : > { %p302_p9 = pnand %p1594_p7, %p301_p8 }
  0x10   : > { %s1911_s22 = sshll.u32 (!%p302_p9), %s1883_s8, 5  ;;  %s338_s18 = sand.u32 (!%p302_p9), 1, %s1796_s12  }
  0x11   : > { %305 = sbr.rel (%p302_p9) target bundleno = 1203 (0x4b3), region = 56  ;;  %p346_p10 = scmp.lt.s32.totalorder (!%p302_p9), %s1911_s22, 37 }
  0x12   : > { %s1595_s23 = sshll.u32 (!%p302_p9), %s338_s18, 1 }
  0x13   : > { %s340_s24 = scalar_lea.vmem (!%p302_p9), [#allocation3], %s1595_s23 }
  0x16   : > { %v1917_v1 = vld [vmem:[%s2500_s1] sm:$0xff]   ;;  %vm561_vm0 = vcmask 695296   ;;  %s347_s25 = scalar_select %p346_p10, %s1911_s22, 37  ;;  %v1806_v2 = vmov 0   ;;  %v439_v3 = vld [vmem:[%s2501_s2 + $0x70] sm:$0xff]  ;;  %v440_v4 = vld [vmem:[%s2501_s2 + $0x78] sm:$0xff] }
  0x17   : > { %1654 = vmatprep.mubr.msk.bf16.mxu0 %vm561_vm0, %v1917_v1  ;;  %1718 = vset.pattern.permute.xlu0 %v1806_v2  ;;  %v437_v5 = vld [vmem:[%s2501_s2 + $0x60] sm:$0xff]  ;;  %v435_v17 = vld [vmem:[%s2501_s2 + $0x50] sm:$0xff]  ;;  %v438_v26 = vld [vmem:[%s2501_s2 + $0x68] sm:$0xff]  ;;  %s1631_s26 = sshll.u32 (%p1900_p5), %s1883_s8, 1 }
  0x18   : > { %1719 = vset.pattern.permute.xlu1 %v1806_v2  ;;  %987 = vmatprep.mubr.bf16.mxu1 %v1806_v2  ;;  %s1597_s28 = sshll.u32 %s347_s25, 3  ;;  %v433_v27 = vld [vmem:[%s2501_s2 + $0x40] sm:$0xff]  ;;  %v436_v28 = vld [vmem:[%s2501_s2 + $0x58] sm:$0xff]  ;;  %v431_v29 = vld [vmem:[%s2501_s2 + $0x30] sm:$0xff]  ;;  %s2452_s25 = scalar_lea.sflag [#allocation4], %s338_s18 }
  0x19   : > { %513 = vperm.xlu0 %1718, %v439_v3   ;;  %s1931_s10 = scalar_lea.vmem %s2499_s0, %s1597_s28  ;;  %503 = vperm.xlu1 %1719, %v437_v5   ;;  %v434_v33 = vld [vmem:[%s2501_s2 + $0x48] sm:$0xff]  ;;  %v429_v34 = vld [vmem:[%s2501_s2 + $0x20] sm:$0xff]  ;;  %v432_v41 = vld [vmem:[%s2501_s2 + $0x38] sm:$0xff]  ;;  %s1521_s27 = ssub.s32 (%p1900_p5), 3, %s1631_s26 }
  0x1a   : > { %v391_v6 = vld [vmem:[%s1931_s10 + $0xf0] sm:$0xff]  ;;  %v392_v7 = vld [vmem:[%s1931_s10 + $0xf8] sm:$0xff]  ;;  %v389_v11 = vld [vmem:[%s1931_s10 + $0xe0] sm:$0xff]  ;;  %p1522_p11 = scmp.lt.s32.totalorder (%p1900_p5), %s1521_s27, 2 }
  0x1b   : > { %v375_v8 = vld [vmem:[%s1931_s10 + $0x70] sm:$0xff]  ;;  %v408_v9 = vpack.c.bf16 %v392_v7, %v391_v6  ;;  %v376_v10 = vld [vmem:[%s1931_s10 + $0x78] sm:$0xff]  ;;  %v390_v12 = vld [vmem:[%s1931_s10 + $0xe8] sm:$0xff] }
  0x1c   : > { %v400_v13 = vpack.c.bf16 %v376_v10, %v375_v8  ;;  %v407_v14 = vpack.c.bf16 %v390_v12, %v389_v11  ;;  %v373_v15 = vld [vmem:[%s1931_s10 + $0x60] sm:$0xff]  ;;  %v374_v16 = vld [vmem:[%s1931_s10 + $0x68] sm:$0xff]  ;;  %v387_v20 = vld [vmem:[%s1931_s10 + $0xd0] sm:$0xff] }
  0x1d   : > { %518 = vperm.xlu0 %1718, %v440_v4   ;;  %1670 = vmatprep.subr.msk.bf16.mxu0 %vm561_vm0, %v408_v9  ;;  %v399_v19 = vpack.c.bf16 %v374_v16, %v373_v15  ;;  %v388_v21 = vld [vmem:[%s1931_s10 + $0xd8] sm:$0xff]  ;;  %v371_v24 = vld [vmem:[%s1931_s10 + $0x50] sm:$0xff]  ;;  %v385_v31 = vld [vmem:[%s1931_s10 + $0xc0] sm:$0xff] }
  0x1e   : > { %v608_v18 = vsel %vm561_vm0, %v400_v13, 0  ;;  %v406_v23 = vpack.c.bf16 %v388_v21, %v387_v20  ;;  %v372_v25 = vld [vmem:[%s1931_s10 + $0x58] sm:$0xff]  ;;  %508 = vperm.xlu1 %1719, %v438_v26   ;;  %v386_v32 = vld [vmem:[%s1931_s10 + $0xc8] sm:$0xff]  ;;  %v369_v37 = vld [vmem:[%s1931_s10 + $0x40] sm:$0xff] }
  0x1f   : > { %1639 = vmatpush3.bf16.xpose.msra.mxu0 %v608_v18  ;;  %v605_v22 = vsel %vm561_vm0, %v399_v19, 0  ;;  %v398_v30 = vpack.c.bf16 %v372_v25, %v371_v24  ;;  %v405_v36 = vpack.c.bf16 %v386_v32, %v385_v31  ;;  %v370_v38 = vld [vmem:[%s1931_s10 + $0x48] sm:$0xff]  ;;  %v367_v39 = vld [vmem:[%s1931_s10 + $0x30] sm:$0xff]  ;;  %v368_v40 = vld [vmem:[%s1931_s10 + $0x38] sm:$0xff] }
  0x20   : > { %1671 = vmatprep.subr.msk.bf16.mxu0 %vm561_vm0, %v407_v14  ;;  %v427_v42 = vld [vmem:[%s2501_s2 + $0x10] sm:$0xff]  ;;  %v397_v43 = vpack.c.bf16 %v370_v38, %v369_v37  ;;  %v384_v45 = vld [vmem:[%s1931_s10 + $0xb8] sm:$0xff]  ;;  %v396_v46 = vpack.c.bf16 %v368_v40, %v367_v39  ;;  %v430_v47 = vld [vmem:[%s2501_s2 + $0x28] sm:$0xff] }
  0x21   : > { %493 = vperm.xlu0 %1718, %v435_v17   ;;  %v602_v35 = vsel %vm561_vm0, %v398_v30, 0  ;;  %v383_v44 = vld [vmem:[%s1931_s10 + $0xb0] sm:$0xff]  ;;  %v425_v48 = vld [vmem:[%s2501_s2] sm:$0xff]  ;;  %v428_v51 = vld [vmem:[%s2501_s2 + $0x18] sm:$0xff] }
  0x22   : > { %498 = vperm.xlu1 %1719, %v436_v28   ;;  %v599_v49 = vsel %vm561_vm0, %v397_v43, 0  ;;  %v404_v50 = vpack.c.bf16 %v384_v45, %v383_v44  ;;  %v596_v52 = vsel %vm561_vm0, %v396_v46, 0  ;;  %v825_v53 = vld [vmem:[%s2503_s4 + $0x70] sm:$0xff]  ;;  %v381_v54 = vld [vmem:[%s1931_s10 + $0xa0] sm:$0xff]  ;;  %v382_v55 = vld [vmem:[%s1931_s10 + $0xa8] sm:$0xff] }
  0x23   : > { %v426_v56 = vld [vmem:[%s2501_s2 + $0x8] sm:$0xff]  ;;  %v823_v57 = vld [vmem:[%s2503_s4 + $0x60] sm:$0xff]  ;;  %v403_v60 = vpack.c.bf16 %v382_v55, %v381_v54  ;;  %v826_v61 = vld [vmem:[%s2503_s4 + $0x78] sm:$0xff] }
  0x24   : > { %v365_v58 = vld [vmem:[%s1931_s10 + $0x20] sm:$0xff]  ;;  %v366_v59 = vld [vmem:[%s1931_s10 + $0x28] sm:$0xff]  ;;  %v821_v62 = vld [vmem:[%s2503_s4 + $0x50] sm:$0xff] }
  0x25   : > { %483 = vperm.xlu0 %1718, %v433_v27   ;;  %v395_v63 = vpack.c.bf16 %v366_v59, %v365_v58  ;;  %v379_v0 = vld [vmem:[%s1931_s10 + $0x90] sm:$0xff]  ;;  %v380_v3 = vld [vmem:[%s1931_s10 + $0x98] sm:$0xff]  ;;  %v824_v4 = vld [vmem:[%s2503_s4 + $0x68] sm:$0xff] }
  0x26   : > { %488 = vperm.xlu1 %1719, %v434_v33   ;;  %v819_v5 = vld [vmem:[%s2503_s4 + $0x40] sm:$0xff]  ;;  %v402_v7 = vpack.c.bf16 %v380_v3, %v379_v0  ;;  %v363_v8 = vld [vmem:[%s1931_s10 + $0x10] sm:$0xff]  ;;  %v364_v9 = vld [vmem:[%s1931_s10 + $0x18] sm:$0xff] }
  0x27   : > { %1641 = vmatpush3.bf16.xpose.msra.mxu0 %v605_v22  ;;  %v593_v6 = vsel %vm561_vm0, %v395_v63, 0  ;;  %v822_v10 = vld [vmem:[%s2503_s4 + $0x58] sm:$0xff]  ;;  %v817_v11 = vld [vmem:[%s2503_s4 + $0x30] sm:$0xff]  ;;  %v394_v12 = vpack.c.bf16 %v364_v9, %v363_v8  ;;  %v377_v13 = vld [vmem:[%s1931_s10 + $0x80] sm:$0xff] }
  0x28   : > { %1672 = vmatprep.subr.msk.bf16.mxu0 %vm561_vm0, %v406_v23  ;;  %v378_v14 = vld [vmem:[%s1931_s10 + $0x88] sm:$0xff]  ;;  %v815_v16 = vld [vmem:[%s2503_s4 + $0x20] sm:$0xff]  ;;  %v818_v21 = vld [vmem:[%s2503_s4 + $0x38] sm:$0xff] }
  0x29   : > { %473 = vperm.xlu0 %1718, %v431_v29   ;;  %v820_v15 = vld [vmem:[%s2503_s4 + $0x48] sm:$0xff]  ;;  %v590_v17 = vsel %vm561_vm0, %v394_v12, 0  ;;  %v401_v18 = vpack.c.bf16 %v378_v14, %v377_v13  ;;  %v361_v19 = vld [vmem:[%s1931_s10] sm:$0xff]  ;;  %v813_v22 = vld [vmem:[%s2503_s4 + $0x10] sm:$0xff] }
  0x2a   : > { %478 = vperm.xlu1 %1719, %v432_v41   ;;  %v362_v20 = vld [vmem:[%s1931_s10 + $0x8] sm:$0xff]  ;;  %v811_v25 = vld [vmem:[%s2503_s4] sm:$0xff]  ;;  %v814_v27 = vld [vmem:[%s2503_s4 + $0x18] sm:$0xff] }
  0x2b   : > { %v393_v23 = vpack.c.bf16 %v362_v20, %v361_v19  ;;  %v816_v24 = vld [vmem:[%s2503_s4 + $0x28] sm:$0xff]  ;;  %v1146_v28 = vld [vmem:[%s2505_s6 + $0x70] sm:$0xff]  ;;  %v1144_v31 = vld [vmem:[%s2505_s6 + $0x60] sm:$0xff] }
  0x2c   : > { %v1721_v29 = vld [vmem:[%s2500_s1 + $0x8] sm:$0xff]   ;;  %v1147_v32 = vld [vmem:[%s2505_s6 + $0x78] sm:$0xff]  ;;  %v1142_v33 = vld [vmem:[%s2505_s6 + $0x50] sm:$0xff] }
  0x2d   : > { %463 = vperm.xlu0 %1718, %v429_v34   ;;  %v587_v26 = vsel %vm561_vm0, %v393_v23, 0  ;;  %v812_v30 = vld [vmem:[%s2503_s4 + $0x8] sm:$0xff]  ;;  %v1722_v34 = vld [vmem:[%s2500_s1 + $0x10] sm:$0xff]   ;;  %v1723_v38 = vld [vmem:[%s2500_s1 + $0x18] sm:$0xff]  }
  0x2e   : > { %468 = vperm.xlu1 %1719, %v430_v47   ;;  %v1138_v37 = vld [vmem:[%s2505_s6 + $0x30] sm:$0xff]  ;;  %v1141_v39 = vld [vmem:[%s2505_s6 + $0x48] sm:$0xff]  ;;  %v1136_v40 = vld [vmem:[%s2505_s6 + $0x20] sm:$0xff] }
  0x2f   : > { %1643 = vmatpush3.bf16.xpose.msra.mxu0 %v602_v35  ;;  %v1140_v35 = vld [vmem:[%s2505_s6 + $0x40] sm:$0xff]  ;;  %v1139_v41 = vld [vmem:[%s2505_s6 + $0x38] sm:$0xff]  ;;  %v1137_v44 = vld [vmem:[%s2505_s6 + $0x28] sm:$0xff] }
  0x30   : > { %1673 = vmatprep.subr.msk.bf16.mxu0 %vm561_vm0, %v405_v36  ;;  %v1143_v36 = vld [vmem:[%s2505_s6 + $0x58] sm:$0xff]  ;;  %v1724_v43 = vld [vmem:[%s2500_s1 + $0x20] sm:$0xff]  }
  0x31   : > { %453 = vperm.xlu0 %1718, %v427_v42   ;;  %v1134_v42 = vld [vmem:[%s2505_s6 + $0x10] sm:$0xff]  ;;  %v1132_v45 = vld [vmem:[%s2505_s6] sm:$0xff]  ;;  %v1135_v46 = vld [vmem:[%s2505_s6 + $0x18] sm:$0xff] }
  0x32   : > { %458 = vperm.xlu1 %1719, %v428_v51   ;;  %v1438_v47 = vld [vmem:[#allocation2] sm:$0x1]  ;;  %v1727_v51 = vld [vmem:[%s2500_s1 + $0x38] sm:$0xff]  }
  0x35   : > { %443 = vperm.xlu0 %1718, %v425_v48   ;;  %v1725_v48 = vld [vmem:[%s2500_s1 + $0x28] sm:$0xff]  }
  0x36   : > { %448 = vperm.xlu1 %1719, %v426_v56  }
  0x37   : > { %1645 = vmatpush3.bf16.xpose.msra.mxu0 %v599_v49  ;;  %v1133_v49 = vld [vmem:[%s2505_s6 + $0x8] sm:$0xff] }
  0x38   : > { %1674 = vmatprep.subr.msk.bf16.mxu0 %vm561_vm0, %v404_v50  ;;  %v1726_v50 = vld [vmem:[%s2500_s1 + $0x30] sm:$0xff]  }
  0x39   : > { %899 = vperm.xlu0 %1718, %v825_v53  }
  0x3a   : > { %904 = vperm.xlu1 %1719, %v826_v61  }
  0x3d   : > { %889 = vperm.xlu0 %1718, %v823_v57  }
  0x3e   : > { %894 = vperm.xlu1 %1719, %v824_v4  }
  0x3f   : > { %1647 = vmatpush3.bf16.xpose.msra.mxu0 %v596_v52 }
  0x40   : > { %1675 = vmatprep.subr.msk.bf16.mxu0 %vm561_vm0, %v403_v60 }
  0x41   : > { %879 = vperm.xlu0 %1718, %v821_v62  }
  0x42   : > { %884 = vperm.xlu1 %1719, %v822_v10  }
  0x45   : > { %869 = vperm.xlu0 %1718, %v819_v5  }
  0x46   : > { %874 = vperm.xlu1 %1719, %v820_v15  }
  0x47   : > { %1649 = vmatpush3.bf16.xpose.msra.mxu0 %v593_v6 }
  0x48   : > { %1676 = vmatprep.subr.msk.bf16.mxu0 %vm561_vm0, %v402_v7 }
  0x49   : > { %859 = vperm.xlu0 %1718, %v817_v11  }
  0x4a   : > { %864 = vperm.xlu1 %1719, %v818_v21  }
  0x4d   : > { %849 = vperm.xlu0 %1718, %v815_v16  }
  0x4e   : > { %854 = vperm.xlu1 %1719, %v816_v24  }
  0x4f   : > { %1651 = vmatpush3.bf16.xpose.msra.mxu0 %v590_v17 }
  0x50   : > { %1677 = vmatprep.subr.msk.bf16.mxu0 %vm561_vm0, %v401_v18 }
  0x51   : > { %839 = vperm.xlu0 %1718, %v813_v22  }
  0x52   : > { %844 = vperm.xlu1 %1719, %v814_v27  }
  0x55   : > { %829 = vperm.xlu0 %1718, %v811_v25  }
  0x56   : > { %834 = vperm.xlu1 %1719, %v812_v30  }
  0x57   : > { %1653 = vmatpush3.bf16.xpose.msra.mxu0 %v587_v26 }
  0x59   : > { %1220 = vperm.xlu0 %1718, %v1146_v28  }
  0x5a   : > { %1225 = vperm.xlu1 %1719, %v1147_v32  }
  0x5d   : > { %1210 = vperm.xlu0 %1718, %v1144_v31  }
  0x5e   : > { %1655 = vmatmul.mubr.msk.bf16.vlgmr.msra.gmra.mxu0 %vm561_vm0, %v1917_v1  ;;  %v1145_v1 = vld [vmem:[%s2505_s6 + $0x68] sm:$0xff] }
  0x5f   : > { %1656 = vmatprep.mubr.msk.bf16.mxu0 %vm561_vm0, %v1721_v29  ;;  %1215 = vperm.xlu1 %1719, %v1145_v1  }
  0x61   : > { %1200 = vperm.xlu0 %1718, %v1142_v33  }
  0x63   : > { %1205 = vperm.xlu1 %1719, %v1143_v36  }
  0x65   : > { %1190 = vperm.xlu0 %1718, %v1140_v35  }
  0x66   : > { %1657 = vmatmul.mubr.msk.bf16.gmra.mxu0 %vm561_vm0, %v1721_v29 }
  0x67   : > { %1658 = vmatprep.mubr.msk.bf16.mxu0 %vm561_vm0, %v1722_v34  ;;  %1195 = vperm.xlu1 %1719, %v1141_v39  }
  0x69   : > { %1180 = vperm.xlu0 %1718, %v1138_v37  }
  0x6b   : > { %1185 = vperm.xlu1 %1719, %v1139_v41  }
  0x6d   : > { %1170 = vperm.xlu0 %1718, %v1136_v40  }
  0x6e   : > { %1659 = vmatmul.mubr.msk.bf16.gmra.mxu0 %vm561_vm0, %v1722_v34 }
  0x6f   : > { %1660 = vmatprep.mubr.msk.bf16.mxu0 %vm561_vm0, %v1723_v38  ;;  %1175 = vperm.xlu1 %1719, %v1137_v44  }
  0x71   : > { %1160 = vperm.xlu0 %1718, %v1134_v42  }
  0x73   : > { %1165 = vperm.xlu1 %1719, %v1135_v46  }
  0x75   : > { %1150 = vperm.xlu0 %1718, %v1132_v45  }
  0x76   : > { %1661 = vmatmul.mubr.msk.bf16.gmra.mxu0 %vm561_vm0, %v1723_v38 }
  0x77   : > { %1662 = vmatprep.mubr.msk.bf16.mxu0 %vm561_vm0, %v1724_v43  ;;  %1155 = vperm.xlu1 %1719, %v1133_v49  }
  0x79   : > { %1441 = vperm.xlu0 %1718, %v1438_v47  }
  0x7e   : > { %1663 = vmatmul.mubr.msk.bf16.gmra.mxu0 %vm561_vm0, %v1724_v43 }
  0x7f   : > { %1664 = vmatprep.mubr.msk.bf16.mxu0 %vm561_vm0, %v1725_v48 }
  0x86   : > { %1665 = vmatmul.mubr.msk.bf16.gmra.mxu0 %vm561_vm0, %v1725_v48 }
  0x87   : > { %1666 = vmatprep.mubr.msk.bf16.mxu0 %vm561_vm0, %v1726_v50 }
  0x8e   : > { %1667 = vmatmul.mubr.msk.bf16.gmra.mxu0 %vm561_vm0, %v1726_v50 }
  0x8f   : > { %1668 = vmatprep.mubr.msk.bf16.mxu0 %vm561_vm0, %v1727_v51 }
  0x94   : > { %v2160_v52 = vpop.permute.xlu0 %513  ;;  %v2162_v53 = vpop.permute.xlu1 %503 }
  0x96   : > { %1669 = vmatmul.mubr.msk.bf16.gmra.mxu0 %vm561_vm0, %v1727_v51 }
  0x97   : > { %1480 = vmatprep.mubr.bf16.mxu0 %v1806_v2 }
  0x98   : > { %v2164_v54 = vpop.permute.xlu0 %518 }
  0x99   : > { %v2166_v55 = vpop.permute.xlu1 %508 }
  0x9c   : > { %v2168_v56 = vpop.permute.xlu0 %493 }
  0x9d   : > { %v2170_v57 = vpop.permute.xlu1 %498 }
  0xa0   : > { %v2172_v58 = vpop.permute.xlu0 %483 }
  0xa1   : > { %v2174_v59 = vpop.permute.xlu1 %488 }
  0xa4   : > { %v2176_v60 = vpop.permute.xlu0 %473 }
  0xa5   : > { %v2178_v61 = vpop.permute.xlu1 %478 }
  0xa8   : > { %v2180_v62 = vpop.permute.xlu0 %463 }
  0xa9   : > { %v2182_v63 = vpop.permute.xlu1 %468 }
  0xac   : > { %v454_v0 = vpop.permute.xlu0 %453 }
  0xad   : > { %v459_v3 = vpop.permute.xlu1 %458 }
  0xb0   : > { %v444_v5 = vpop.permute.xlu0 %443 }
  0xb1   : > { %v449_v8 = vpop.permute.xlu1 %448 }
 0x11e   : > { %v668_v4 = vpop.f32.mrf.mxu0 }
 0x11f   : > { %v669_v7 = vadd.f32 %v668_v4, %v444_v5 }
 0x120   : > { %v670_v6 = vpop.f32.mrf.mxu0 }
 0x121   : > { %v671_v10 = vadd.f32 %v670_v6, %v444_v5  ;;  %v747_v13 = vmax.f32 %v669_v7, 0.0 }
 0x122   : > { %v672_v9 = vpop.f32.mrf.mxu0 }
 0x123   : > { %v673_v11 = vadd.f32 %v672_v9, %v449_v8  ;;  %v748_v17 = vmax.f32 %v671_v10, 0.0 }
 0x124   : > { %v674_v12 = vpop.f32.mrf.mxu0 }
 0x125   : > { %v749_v14 = vmax.f32 %v673_v11, 0.0  ;;  %v675_v15 = vadd.f32 %v674_v12, %v449_v8 }
 0x126   : > { %v678_v16 = vpop.f32.mrf.mxu0 }
 0x127   : > { %v2184_v18 = vpack.c.bf16 %v749_v14, %v747_v13  ;;  %v750_v19 = vmax.f32 %v675_v15, 0.0  ;;  %v679_v22 = vadd.f32 %v678_v16, %v454_v0 }
 0x128   : > { %v680_v20 = vpop.f32.mrf.mxu0 }
 0x129   : > { %v2186_v21 = vpack.c.bf16 %v750_v19, %v748_v17  ;;  %v681_v24 = vadd.f32 %v680_v20, %v454_v0  ;;  %v751_v27 = vmax.f32 %v679_v22, 0.0 }
 0x12a   : > { %v682_v23 = vpop.f32.mrf.mxu0 }
 0x12b   : > { %v683_v25 = vadd.f32 %v682_v23, %v459_v3  ;;  %v752_v31 = vmax.f32 %v681_v24, 0.0 }
 0x12c   : > { %v684_v26 = vpop.f32.mrf.mxu0 }
 0x12d   : > { %v753_v28 = vmax.f32 %v683_v25, 0.0  ;;  %v685_v29 = vadd.f32 %v684_v26, %v459_v3 }
 0x12e   : > { %v2188_v30 = vpop.f32.mrf.mxu0 }
 0x12f   : > { %v2190_v32 = vpack.c.bf16 %v753_v28, %v751_v27  ;;  %v754_v33 = vmax.f32 %v685_v29, 0.0 }
 0x130   : > { %v2192_v34 = vpop.f32.mrf.mxu0 }
 0x131   : > { %v2194_v1 = vpack.c.bf16 %v754_v33, %v752_v31 }
 0x132   : > { %v2196_v35 = vpop.f32.mrf.mxu0 }
 0x134   : > { %v2198_v36 = vpop.f32.mrf.mxu0 }
 0x136   : > { %v2200_v37 = vpop.f32.mrf.mxu0 }
 0x138   : > { %v700_v38 = vpop.f32.mrf.mxu0 }
 0x13a   : > { %v702_v39 = vpop.f32.mrf.mxu0 }
 0x13c   : > { %v704_v40 = vpop.f32.mrf.mxu0 }
 0x13e   : > { %v708_v41 = vpop.f32.mrf.mxu0 }
 0x140   : > { %v710_v42 = vpop.f32.mrf.mxu0 }
 0x142   : > { %v712_v43 = vpop.f32.mrf.mxu0 }
 0x144   : > { %v714_v44 = vpop.f32.mrf.mxu0 }
 0x146   : > { %v718_v45 = vpop.f32.mrf.mxu0 }
 0x147   : > { %v719_v29 = vadd.f32 %v718_v45, %v2168_v56 }
 0x148   : > { %v720_v46 = vpop.f32.mrf.mxu0 }
 0x149   : > { %v721_v23 = vadd.f32 %v720_v46, %v2168_v56  ;;  %v713_v46 = vadd.f32 %v712_v43, %v2174_v59  ;;  %v701_v56 = vadd.f32 %v700_v38, %v2176_v60 }
 0x14a   : > { %v722_v47 = vpop.f32.mrf.mxu0 }
 0x14b   : > { %v723_v25 = vadd.f32 %v722_v47, %v2170_v57  ;;  %v768_v33 = vmax.f32 %v721_v23, 0.0  ;;  %v760_v38 = vmax.f32 %v701_v56, 0.0 }
 0x14c   : > { %v724_v48 = vpop.f32.mrf.mxu0 }
 0x14d   : > { %v725_v15 = vadd.f32 %v724_v48, %v2170_v57  ;;  %v769_v48 = vmax.f32 %v723_v25, 0.0  ;;  %v705_v57 = vadd.f32 %v704_v40, %v2178_v61  ;;  %v699_v40 = vadd.f32 %v2200_v37, %v2176_v60 }
 0x14e   : > { %v728_v49 = vpop.f32.mrf.mxu0 }
 0x14f   : > { %v729_v20 = vadd.f32 %v728_v49, %v2162_v53  ;;  %v762_v43 = vmax.f32 %v705_v57, 0.0 }
 0x150   : > { %v730_v50 = vpop.f32.mrf.mxu0 }
 0x151   : > { %v731_v11 = vadd.f32 %v730_v50, %v2162_v53  ;;  %v771_v31 = vmax.f32 %v729_v20, 0.0  ;;  %v711_v53 = vadd.f32 %v710_v42, %v2172_v58  ;;  %v703_v42 = vadd.f32 %v702_v39, %v2178_v61 }
 0x152   : > { %v732_v51 = vpop.f32.mrf.mxu0  ;;  %v693_v61 = vadd.f32 %v2196_v35, %v2182_v63  ;;  %v1735_v35 = vld [vmem:[%s2502_s3 + $0x38] sm:$0xff]  }
 0x153   : > { %v733_v13 = vadd.f32 %v732_v51, %v2166_v55  ;;  %v772_v24 = vmax.f32 %v731_v11, 0.0  ;;  %v767_v51 = vmax.f32 %v719_v29, 0.0  ;;  %v764_v45 = vmax.f32 %v711_v53, 0.0 }
 0x154   : > { %v734_v0 = vpop.f32.mrf.mxu0  ;;  %v761_v39 = vmax.f32 %v703_v42, 0.0  ;;  %v757_v37 = vmax.f32 %v693_v61, 0.0 }
 0x155   : > { %v735_v6 = vadd.f32 %v734_v0, %v2166_v55  ;;  %v773_v26 = vmax.f32 %v733_v13, 0.0  ;;  %v770_v55 = vmax.f32 %v725_v15, 0.0  ;;  %v765_v0 = vmax.f32 %v713_v46, 0.0  ;;  %v2269_v13 = vpop.permute.xlu1 %904 }
 0x156   : > { %v738_v3 = vpop.f32.mrf.mxu0 }
 0x157   : > { %v739_v9 = vadd.f32 %v738_v3, %v2160_v52  ;;  %v774_v16 = vmax.f32 %v735_v6, 0.0  ;;  %v807_v49 = vpack.c.bf16 %v773_v26, %v771_v31  ;;  %v806_v50 = vpack.c.bf16 %v770_v55, %v768_v33 }
 0x158   : > { %v740_v4 = vpop.f32.mrf.mxu0  ;;  %v805_v3 = vpack.c.bf16 %v769_v48, %v767_v51 }
 0x159   : > { %v741_v7 = vadd.f32 %v740_v4, %v2160_v52  ;;  %v775_v22 = vmax.f32 %v739_v9, 0.0  ;;  %v808_v28 = vpack.c.bf16 %v774_v16, %v772_v24  ;;  %v2273_v15 = vpop.permute.xlu1 %894 }
 0x15a   : > { %v742_v5 = vpop.f32.mrf.mxu0 }
 0x15b   : > { %v743_v8 = vadd.f32 %v742_v5, %v2164_v54  ;;  %v776_v17 = vmax.f32 %v741_v7, 0.0  ;;  %v802_v7 = vpack.c.bf16 %v762_v43, %v760_v38 }
 0x15c   : > { %v744_v10 = vpop.f32.mrf.mxu0 }
 0x15d   : > { %v745_v12 = vadd.f32 %v744_v10, %v2164_v54  ;;  %v777_v14 = vmax.f32 %v743_v8, 0.0  ;;  %v715_v54 = vadd.f32 %v714_v44, %v2174_v59  ;;  %v709_v44 = vadd.f32 %v708_v41, %v2172_v58 }
 0x15e   : > { %v695_v59 = vadd.f32 %v2198_v36, %v2182_v63  ;;  %v691_v58 = vadd.f32 %v2192_v34, %v2180_v62  ;;  %v689_v36 = vadd.f32 %v2188_v30, %v2180_v62  ;;  %v759_v8 = vmax.f32 %v699_v40, 0.0  ;;  %v1728_v62 = vld [vmem:[%s2502_s3] sm:$0xff]   ;;  %v1729_v63 = vld [vmem:[%s2502_s3 + $0x8] sm:$0xff]  }
 0x15f   : > { %v778_v19 = vmax.f32 %v745_v12, 0.0  ;;  %v809_v27 = vpack.c.bf16 %v777_v14, %v775_v22  ;;  %v766_v47 = vmax.f32 %v715_v54, 0.0  ;;  %v763_v5 = vmax.f32 %v709_v44, 0.0  ;;  %v1732_v30 = vld [vmem:[%s2502_s3 + $0x20] sm:$0xff]   ;;  %v2267_v12 = vpop.permute.xlu0 %899 }
 0x160   : > { %v758_v6 = vmax.f32 %v695_v59, 0.0  ;;  %v756_v60 = vmax.f32 %v691_v58, 0.0  ;;  %v801_v9 = vpack.c.bf16 %v761_v39, %v759_v8  ;;  %v755_v34 = vmax.f32 %v689_v36, 0.0 }
 0x161   : > { %v810_v52 = vpack.c.bf16 %v778_v19, %v776_v17  ;;  %v804_v4 = vpack.c.bf16 %v766_v47, %v764_v45  ;;  %v803_v41 = vpack.c.bf16 %v765_v0, %v763_v5  ;;  %v2277_v17 = vpop.permute.xlu1 %884 }
 0x162   : > { %v800_v10 = vpack.c.bf16 %v758_v6, %v756_v60  ;;  %v799_v11 = vpack.c.bf16 %v757_v37, %v755_v34 }
 0x163   : > { %955 = vmatprep.subr.bf16.mxu1 %v810_v52  ;;  %v2271_v14 = vpop.permute.xlu0 %889 }
 0x164   : > { %956 = vmatpush1.bf16.msra.mxu1 %v809_v27 }
 0x165   : > { %957 = vmatprep.subr.bf16.mxu1 %v808_v28  ;;  %v2281_v20 = vpop.permute.xlu1 %874 }
 0x167   : > { %v2275_v16 = vpop.permute.xlu0 %879 }
 0x168   : > { %958 = vmatpush1.bf16.msra.mxu1 %v807_v49 }
 0x169   : > { %959 = vmatprep.subr.bf16.mxu1 %v806_v50  ;;  %v2285_v23 = vpop.permute.xlu1 %864 }
 0x16b   : > { %v2279_v19 = vpop.permute.xlu0 %869 }
 0x16c   : > { %960 = vmatpush1.bf16.msra.mxu1 %v805_v3 }
 0x16d   : > { %961 = vmatprep.subr.bf16.mxu1 %v804_v4  ;;  %v2289_v52 = vpop.permute.xlu1 %854 }
 0x16f   : > { %v2283_v22 = vpop.permute.xlu0 %859 }
 0x170   : > { %962 = vmatpush1.bf16.msra.mxu1 %v803_v41 }
 0x171   : > { %963 = vmatprep.subr.bf16.mxu1 %v802_v7  ;;  %v845_v26 = vpop.permute.xlu1 %844 }
 0x173   : > { %v2287_v24 = vpop.permute.xlu0 %849 }
 0x174   : > { %964 = vmatpush1.bf16.msra.mxu1 %v801_v9 }
 0x175   : > { %965 = vmatprep.subr.bf16.mxu1 %v800_v10  ;;  %v835_v29 = vpop.permute.xlu1 %834 }
 0x177   : > { %v840_v25 = vpop.permute.xlu0 %839 }
 0x178   : > { %966 = vmatpush1.bf16.msra.mxu1 %v799_v11 }
 0x179   : > { %967 = vmatprep.subr.bf16.mxu1 %v2194_v1  ;;  %v1734_v1 = vld [vmem:[%s2502_s3 + $0x30] sm:$0xff]  }
 0x17b   : > { %v830_v54 = vpop.permute.xlu0 %829 }
 0x17c   : > { %968 = vmatpush1.bf16.msra.mxu1 %v2190_v32  ;;  %v1733_v32 = vld [vmem:[%s2502_s3 + $0x28] sm:$0xff]  }
 0x17d   : > { %969 = vmatprep.subr.bf16.mxu1 %v2186_v21  ;;  %v1730_v21 = vld [vmem:[%s2502_s3 + $0x10] sm:$0xff]  }
 0x180   : > { %970 = vmatpush1.bf16.msra.mxu1 %v2184_v18  ;;  %v1731_v18 = vld [vmem:[%s2502_s3 + $0x18] sm:$0xff]  }
 0x183   : > { %988 = vmatmul.mubr.bf16.vlgmr.msra.gmra.mxu1 %v1728_v62 }
 0x184   : > { %997 = vmatprep.mubr.bf16.mxu1 %v1806_v2 }
 0x18b   : > { %998 = vmatmul.mubr.bf16.gmra.mxu1 %v1729_v63 }
 0x18c   : > { %1007 = vmatprep.mubr.bf16.mxu1 %v1806_v2 }
 0x193   : > { %1008 = vmatmul.mubr.bf16.gmra.mxu1 %v1730_v21 }
 0x194   : > { %1017 = vmatprep.mubr.bf16.mxu1 %v1806_v2 }
 0x19b   : > { %1018 = vmatmul.mubr.bf16.gmra.mxu1 %v1731_v18 }
 0x19c   : > { %1027 = vmatprep.mubr.bf16.mxu1 %v1806_v2 }
 0x1a3   : > { %1028 = vmatmul.mubr.bf16.gmra.mxu1 %v1732_v30 }
 0x1a4   : > { %1037 = vmatprep.mubr.bf16.mxu1 %v1806_v2 }
 0x1ab   : > { %1038 = vmatmul.mubr.bf16.gmra.mxu1 %v1733_v32 }
 0x1ac   : > { %1047 = vmatprep.mubr.bf16.mxu1 %v1806_v2 }
 0x1b3   : > { %1048 = vmatmul.mubr.bf16.gmra.mxu1 %v1734_v1 }
 0x1b4   : > { %1057 = vmatprep.mubr.bf16.mxu1 %v1806_v2 }
 0x1bb   : > { %1058 = vmatmul.mubr.bf16.gmra.mxu1 %v1735_v35 }
 0x1bc   : > { %1308 = vmatprep.mubr.bf16.mxu1 %v1806_v2 }
 0x243   : > { %v989_v27 = vpop.f32.mrf.mxu1 }
 0x244   : > { %v990_v28 = vadd.f32 %v989_v27, %v830_v54 }
 0x245   : > { %v991_v55 = vpop.f32.mrf.mxu1 }
 0x246   : > { %v992_v53 = vadd.f32 %v991_v55, %v830_v54  ;;  %v1068_v48 = vmax.f32 %v990_v28, 0.0 }
 0x247   : > { %v993_v31 = vpop.f32.mrf.mxu1 }
 0x248   : > { %v994_v33 = vadd.f32 %v993_v31, %v835_v29  ;;  %v1069_v50 = vmax.f32 %v992_v53, 0.0 }
 0x249   : > { %v995_v46 = vpop.f32.mrf.mxu1 }
 0x24a   : > { %v1070_v49 = vmax.f32 %v994_v33, 0.0  ;;  %v996_v57 = vadd.f32 %v995_v46, %v835_v29 }
 0x24b   : > { %v999_v47 = vpop.f32.mrf.mxu1 }
 0x24c   : > { %v2291_v44 = vpack.c.bf16 %v1070_v49, %v1068_v48  ;;  %v1071_v51 = vmax.f32 %v996_v57, 0.0  ;;  %v1000_v42 = vadd.f32 %v999_v47, %v840_v25 }
 0x24d   : > { %v1001_v56 = vpop.f32.mrf.mxu1 }
 0x24e   : > { %v2293_v45 = vpack.c.bf16 %v1071_v51, %v1069_v50  ;;  %v1002_v3 = vadd.f32 %v1001_v56, %v840_v25  ;;  %v1072_v4 = vmax.f32 %v1000_v42, 0.0 }
 0x24f   : > { %v1003_v0 = vpop.f32.mrf.mxu1 }
 0x250   : > { %v1004_v59 = vadd.f32 %v1003_v0, %v845_v26  ;;  %v1073_v38 = vmax.f32 %v1002_v3, 0.0 }
 0x251   : > { %v1005_v43 = vpop.f32.mrf.mxu1 }
 0x252   : > { %v1074_v40 = vmax.f32 %v1004_v59, 0.0  ;;  %v1006_v5 = vadd.f32 %v1005_v43, %v845_v26 }
 0x253   : > { %v2295_v58 = vpop.f32.mrf.mxu1 }
 0x254   : > { %v2297_v61 = vpack.c.bf16 %v1074_v40, %v1072_v4  ;;  %v1075_v39 = vmax.f32 %v1006_v5, 0.0 }
 0x255   : > { %v2299_v41 = vpop.f32.mrf.mxu1 }
 0x256   : > { %v2301_v6 = vpack.c.bf16 %v1075_v39, %v1073_v38 }
 0x257   : > { %v2303_v7 = vpop.f32.mrf.mxu1 }
 0x259   : > { %v2305_v36 = vpop.f32.mrf.mxu1 }
 0x25b   : > { %v2307_v8 = vpop.f32.mrf.mxu1 }
 0x25d   : > { %v1021_v60 = vpop.f32.mrf.mxu1 }
 0x25f   : > { %v1023_v37 = vpop.f32.mrf.mxu1 }
 0x261   : > { %v1025_v9 = vpop.f32.mrf.mxu1 }
 0x263   : > { %v1029_v10 = vpop.f32.mrf.mxu1 }
 0x265   : > { %v1031_v34 = vpop.f32.mrf.mxu1 }
 0x267   : > { %v1033_v11 = vpop.f32.mrf.mxu1 }
 0x269   : > { %v1035_v62 = vpop.f32.mrf.mxu1 }
 0x26b   : > { %v1039_v63 = vpop.f32.mrf.mxu1 }
 0x26c   : > { %v1040_v5 = vadd.f32 %v1039_v63, %v2275_v16 }
 0x26d   : > { %v1041_v21 = vpop.f32.mrf.mxu1 }
 0x26e   : > { %v1042_v0 = vadd.f32 %v1041_v21, %v2275_v16  ;;  %v1034_v21 = vadd.f32 %v1033_v11, %v2281_v20  ;;  %v1022_v16 = vadd.f32 %v1021_v60, %v2283_v22 }
 0x26f   : > { %v1043_v18 = vpop.f32.mrf.mxu1 }
 0x270   : > { %v1044_v59 = vadd.f32 %v1043_v18, %v2277_v17  ;;  %v1089_v39 = vmax.f32 %v1042_v0, 0.0  ;;  %v1081_v60 = vmax.f32 %v1022_v16, 0.0 }
 0x271   : > { %v1045_v30 = vpop.f32.mrf.mxu1 }
 0x272   : > { %v1046_v57 = vadd.f32 %v1045_v30, %v2277_v17  ;;  %v1090_v30 = vmax.f32 %v1044_v59, 0.0  ;;  %v1026_v17 = vadd.f32 %v1025_v9, %v2285_v23  ;;  %v1020_v9 = vadd.f32 %v2307_v8, %v2283_v22 }
 0x273   : > { %v1049_v32 = vpop.f32.mrf.mxu1 }
 0x274   : > { %v1050_v56 = vadd.f32 %v1049_v32, %v2271_v14  ;;  %v1083_v11 = vmax.f32 %v1026_v17, 0.0 }
 0x275   : > { %v1051_v1 = vpop.f32.mrf.mxu1 }
 0x276   : > { %v1052_v33 = vadd.f32 %v1051_v1, %v2271_v14  ;;  %v1092_v38 = vmax.f32 %v1050_v56, 0.0  ;;  %v1032_v14 = vadd.f32 %v1031_v34, %v2279_v19  ;;  %v1024_v34 = vadd.f32 %v1023_v37, %v2285_v23 }
 0x277   : > { %v1053_v35 = vpop.f32.mrf.mxu1  ;;  %v1014_v23 = vadd.f32 %v2303_v7, %v2289_v52  ;;  %v1743_v7 = vld [vmem:[%s2504_s5 + $0x38] sm:$0xff]  }
 0x278   : > { %v1054_v48 = vadd.f32 %v1053_v35, %v2273_v15  ;;  %v1093_v3 = vmax.f32 %v1052_v33, 0.0  ;;  %v1088_v35 = vmax.f32 %v1040_v5, 0.0  ;;  %v1085_v63 = vmax.f32 %v1032_v14, 0.0 }
 0x279   : > { %v1055_v25 = vpop.f32.mrf.mxu1  ;;  %v1082_v37 = vmax.f32 %v1024_v34, 0.0  ;;  %v1078_v8 = vmax.f32 %v1014_v23, 0.0 }
 0x27a   : > { %v1056_v55 = vadd.f32 %v1055_v25, %v2273_v15  ;;  %v1094_v43 = vmax.f32 %v1054_v48, 0.0  ;;  %v1091_v15 = vmax.f32 %v1046_v57, 0.0  ;;  %v1086_v25 = vmax.f32 %v1034_v21, 0.0  ;;  %v2375_v48 = vpop.permute.xlu1 %1225 }
 0x27b   : > { %v1059_v26 = vpop.f32.mrf.mxu1 }
 0x27c   : > { %v1060_v31 = vadd.f32 %v1059_v26, %v2267_v12  ;;  %v1095_v47 = vmax.f32 %v1056_v55, 0.0  ;;  %v1128_v32 = vpack.c.bf16 %v1094_v43, %v1092_v38  ;;  %v1127_v1 = vpack.c.bf16 %v1091_v15, %v1089_v39 }
 0x27d   : > { %v1061_v27 = vpop.f32.mrf.mxu1  ;;  %v1126_v26 = vpack.c.bf16 %v1090_v30, %v1088_v35 }
 0x27e   : > { %v1062_v28 = vadd.f32 %v1061_v27, %v2267_v12  ;;  %v1096_v42 = vmax.f32 %v1060_v31, 0.0  ;;  %v1129_v40 = vpack.c.bf16 %v1095_v47, %v1093_v3  ;;  %v2379_v57 = vpop.permute.xlu1 %1215 }
 0x27f   : > { %v1063_v54 = vpop.f32.mrf.mxu1 }
 0x280   : > { %v1064_v29 = vadd.f32 %v1063_v54, %v2269_v13  ;;  %v1097_v50 = vmax.f32 %v1062_v28, 0.0  ;;  %v1123_v28 = vpack.c.bf16 %v1083_v11, %v1081_v60 }
 0x281   : > { %v1065_v53 = vpop.f32.mrf.mxu1 }
 0x282   : > { %v1066_v46 = vadd.f32 %v1065_v53, %v2269_v13  ;;  %v1098_v49 = vmax.f32 %v1064_v29, 0.0  ;;  %v1036_v13 = vadd.f32 %v1035_v62, %v2281_v20  ;;  %v1030_v62 = vadd.f32 %v1029_v10, %v2279_v19 }
 0x283   : > { %v1016_v20 = vadd.f32 %v2305_v36, %v2289_v52  ;;  %v1012_v19 = vadd.f32 %v2299_v41, %v2287_v24  ;;  %v1010_v36 = vadd.f32 %v2295_v58, %v2287_v24  ;;  %v1080_v29 = vmax.f32 %v1020_v9, 0.0  ;;  %v1736_v24 = vld [vmem:[%s2504_s5] sm:$0xff]   ;;  %v1737_v52 = vld [vmem:[%s2504_s5 + $0x8] sm:$0xff]  }
 0x284   : > { %v1099_v51 = vmax.f32 %v1066_v46, 0.0  ;;  %v1130_v4 = vpack.c.bf16 %v1098_v49, %v1096_v42  ;;  %v1087_v18 = vmax.f32 %v1036_v13, 0.0  ;;  %v1084_v54 = vmax.f32 %v1030_v62, 0.0  ;;  %v1740_v58 = vld [vmem:[%s2504_s5 + $0x20] sm:$0xff]   ;;  %v2373_v46 = vpop.permute.xlu0 %1220 }
 0x285   : > { %v1079_v55 = vmax.f32 %v1016_v20, 0.0  ;;  %v1077_v22 = vmax.f32 %v1012_v19, 0.0  ;;  %v1122_v31 = vpack.c.bf16 %v1082_v37, %v1080_v29  ;;  %v1076_v41 = vmax.f32 %v1010_v36, 0.0 }
 0x286   : > { %v1131_v12 = vpack.c.bf16 %v1099_v51, %v1097_v50  ;;  %v1125_v27 = vpack.c.bf16 %v1087_v18, %v1085_v63  ;;  %v1124_v10 = vpack.c.bf16 %v1086_v25, %v1084_v54  ;;  %v2383_v50 = vpop.permute.xlu1 %1205 }
 0x287   : > { %v1121_v53 = vpack.c.bf16 %v1079_v55, %v1077_v22  ;;  %v1120_v33 = vpack.c.bf16 %v1078_v8, %v1076_v41 }
 0x288   : > { %1276 = vmatprep.subr.bf16.mxu1 %v1131_v12  ;;  %v2377_v49 = vpop.permute.xlu0 %1210 }
 0x289   : > { %1277 = vmatpush1.bf16.msra.mxu1 %v1130_v4 }
 0x28a   : > { %1278 = vmatprep.subr.bf16.mxu1 %v1129_v40 }
 0x28c   : > { %v2381_v47 = vpop.permute.xlu0 %1200 }
 0x28d   : > { %1279 = vmatpush1.bf16.msra.mxu1 %v1128_v32 }
 0x28e   : > { %1280 = vmatprep.subr.bf16.mxu1 %v1127_v1 }
 0x290   : > { %v2385_v51 = vpop.permute.xlu0 %1190 }
 0x291   : > { %1281 = vmatpush1.bf16.msra.mxu1 %v1126_v26 }
 0x292   : > { %1282 = vmatprep.subr.bf16.mxu1 %v1125_v27 }
 0x294   : > { %v2389_v56 = vpop.permute.xlu0 %1180 }
 0x295   : > { %1283 = vmatpush1.bf16.msra.mxu1 %v1124_v10 }
 0x296   : > { %1284 = vmatprep.subr.bf16.mxu1 %v1123_v28 }
 0x298   : > { %v2393_v0 = vpop.permute.xlu0 %1170 }
 0x299   : > { %1285 = vmatpush1.bf16.msra.mxu1 %v1122_v31 }
 0x29a   : > { %1286 = vmatprep.subr.bf16.mxu1 %v1121_v53 }
 0x29c   : > { %v1161_v12 = vpop.permute.xlu0 %1160 }
 0x29d   : > { %1287 = vmatpush1.bf16.msra.mxu1 %v1120_v33 }
 0x29e   : > { %1288 = vmatprep.subr.bf16.mxu1 %v2301_v6  ;;  %v1742_v6 = vld [vmem:[%s2504_s5 + $0x30] sm:$0xff]  }
 0x2a0   : > { %v1151_v4 = vpop.permute.xlu0 %1150 }
 0x2a1   : > { %1289 = vmatpush1.bf16.msra.mxu1 %v2297_v61  ;;  %v1741_v61 = vld [vmem:[%s2504_s5 + $0x28] sm:$0xff]  }
 0x2a2   : > { %1290 = vmatprep.subr.bf16.mxu1 %v2293_v45  ;;  %v1738_v45 = vld [vmem:[%s2504_s5 + $0x10] sm:$0xff]  }
 0x2a5   : > { %1291 = vmatpush1.bf16.msra.mxu1 %v2291_v44  ;;  %v1739_v44 = vld [vmem:[%s2504_s5 + $0x18] sm:$0xff]  }
 0x2a8   : > { %1309 = vmatmul.mubr.bf16.vlgmr.msra.gmra.mxu1 %v1736_v24 }
 0x2a9   : > { %1318 = vmatprep.mubr.bf16.mxu1 %v1806_v2 }
 0x2b0   : > { %1319 = vmatmul.mubr.bf16.gmra.mxu1 %v1737_v52 }
 0x2b1   : > { %1328 = vmatprep.mubr.bf16.mxu1 %v1806_v2 }
 0x2b8   : > { %1329 = vmatmul.mubr.bf16.gmra.mxu1 %v1738_v45 }
 0x2b9   : > { %1338 = vmatprep.mubr.bf16.mxu1 %v1806_v2 }
 0x2c0   : > { %1339 = vmatmul.mubr.bf16.gmra.mxu1 %v1739_v44 }
 0x2c1   : > { %1348 = vmatprep.mubr.bf16.mxu1 %v1806_v2 }
 0x2c8   : > { %1349 = vmatmul.mubr.bf16.gmra.mxu1 %v1740_v58 }
 0x2c9   : > { %1358 = vmatprep.mubr.bf16.mxu1 %v1806_v2 }
 0x2d0   : > { %1359 = vmatmul.mubr.bf16.gmra.mxu1 %v1741_v61 }
 0x2d1   : > { %1368 = vmatprep.mubr.bf16.mxu1 %v1806_v2 }
 0x2d8   : > { %1369 = vmatmul.mubr.bf16.gmra.mxu1 %v1742_v6 }
 0x2d9   : > { %1378 = vmatprep.mubr.bf16.mxu1 %v1806_v2  ;;  %v2387_v2 = vpop.permute.xlu1 %1195 }
 0x2dd   : > { %v2391_v42 = vpop.permute.xlu1 %1185 }
 0x2e0   : > { %1379 = vmatmul.mubr.bf16.gmra.mxu1 %v1743_v7 }
 0x2e1   : > { %v2395_v3 = vpop.permute.xlu1 %1175 }
 0x2e5   : > { %v1166_v59 = vpop.permute.xlu1 %1165 }
 0x2e9   : > { %v1156_v40 = vpop.permute.xlu1 %1155 }
 0x368   : > { %v1310_v43 = vpop.f32.mrf.mxu1 }
 0x369   : > { %v1311_v15 = vadd.f32 %v1310_v43, %v1151_v4 }
 0x36a   : > { %v1312_v13 = vpop.f32.mrf.mxu1 }
 0x36b   : > { %v1313_v38 = vadd.f32 %v1312_v13, %v1151_v4  ;;  %v1389_v21 = vmax.f32 %v1311_v15, 0.0 }
 0x36c   : > { %v1314_v5 = vpop.f32.mrf.mxu1 }
 0x36d   : > { %v1315_v14 = vadd.f32 %v1314_v5, %v1156_v40  ;;  %v1390_v18 = vmax.f32 %v1313_v38, 0.0 }
 0x36e   : > { %v1316_v39 = vpop.f32.mrf.mxu1 }
 0x36f   : > { %v1391_v30 = vmax.f32 %v1315_v14, 0.0  ;;  %v1317_v32 = vadd.f32 %v1316_v39, %v1156_v40 }
 0x370   : > { %v1320_v17 = vpop.f32.mrf.mxu1 }
 0x371   : > { %v2397_v1 = vpack.c.bf16 %v1391_v30, %v1389_v21  ;;  %v1392_v62 = vmax.f32 %v1317_v32, 0.0  ;;  %v1321_v63 = vadd.f32 %v1320_v17, %v1161_v12 }
 0x372   : > { %v1322_v35 = vpop.f32.mrf.mxu1 }
 0x373   : > { %v2399_v16 = vpack.c.bf16 %v1392_v62, %v1390_v18  ;;  %v1323_v25 = vadd.f32 %v1322_v35, %v1161_v12  ;;  %v1393_v11 = vmax.f32 %v1321_v63, 0.0 }
 0x374   : > { %v1324_v34 = vpop.f32.mrf.mxu1 }
 0x375   : > { %v1325_v26 = vadd.f32 %v1324_v34, %v1166_v59  ;;  %v1394_v19 = vmax.f32 %v1323_v25, 0.0 }
 0x376   : > { %v1326_v20 = vpop.f32.mrf.mxu1 }
 0x377   : > { %v1395_v27 = vmax.f32 %v1325_v26, 0.0  ;;  %v1327_v9 = vadd.f32 %v1326_v20, %v1166_v59 }
 0x378   : > { %v2401_v54 = vpop.f32.mrf.mxu1 }
 0x379   : > { %v2403_v60 = vpack.c.bf16 %v1395_v27, %v1393_v11  ;;  %v1396_v23 = vmax.f32 %v1327_v9, 0.0 }
 0x37a   : > { %v2405_v37 = vpop.f32.mrf.mxu1 }
 0x37b   : > { %v2407_v10 = vpack.c.bf16 %v1396_v23, %v1394_v19 }
 0x37c   : > { %v2409_v55 = vpop.f32.mrf.mxu1 }
 0x37e   : > { %v2411_v28 = vpop.f32.mrf.mxu1 }
 0x380   : > { %v2413_v36 = vpop.f32.mrf.mxu1 }
 0x382   : > { %v1342_v29 = vpop.f32.mrf.mxu1 }
 0x384   : > { %v1344_v22 = vpop.f32.mrf.mxu1 }
 0x386   : > { %v1346_v8 = vpop.f32.mrf.mxu1 }
 0x388   : > { %v1350_v31 = vpop.f32.mrf.mxu1 }
 0x38a   : > { %v1352_v53 = vpop.f32.mrf.mxu1 }
 0x38c   : > { %v1354_v41 = vpop.f32.mrf.mxu1 }
 0x38d   : > { %v1355_v23 = vadd.f32 %v1354_v41, %v2387_v2 }
 0x38e   : > { %v1356_v33 = vpop.f32.mrf.mxu1 }
 0x390   : > { %v1360_v24 = vpop.f32.mrf.mxu1 }
 0x391   : > { %v1361_v27 = vadd.f32 %v1360_v24, %v2381_v47 }
 0x392   : > { %v1362_v52 = vpop.f32.mrf.mxu1 }
 0x393   : > { %v1363_v63 = vadd.f32 %v1362_v52, %v2381_v47  ;;  %v1343_v47 = vadd.f32 %v1342_v29, %v2389_v56 }
 0x394   : > { %v1364_v45 = vpop.f32.mrf.mxu1 }
 0x395   : > { %v1365_v25 = vadd.f32 %v1364_v45, %v2383_v50  ;;  %v1410_v19 = vmax.f32 %v1363_v63, 0.0  ;;  %v1402_v29 = vmax.f32 %v1343_v47, 0.0 }
 0x396   : > { %v1366_v44 = vpop.f32.mrf.mxu1 }
 0x397   : > { %v1367_v30 = vadd.f32 %v1366_v44, %v2383_v50  ;;  %v1411_v52 = vmax.f32 %v1365_v25, 0.0  ;;  %v1347_v50 = vadd.f32 %v1346_v8, %v2391_v42  ;;  %v1341_v8 = vadd.f32 %v2413_v36, %v2389_v56 }
 0x398   : > { %v1370_v58 = vpop.f32.mrf.mxu1 }
 0x399   : > { %v1371_v62 = vadd.f32 %v1370_v58, %v2377_v49  ;;  %v1404_v41 = vmax.f32 %v1347_v50, 0.0 }
 0x39a   : > { %v1372_v61 = vpop.f32.mrf.mxu1 }
 0x39b   : > { %v1373_v38 = vadd.f32 %v1372_v61, %v2377_v49  ;;  %v1413_v9 = vmax.f32 %v1371_v62, 0.0  ;;  %v1353_v49 = vadd.f32 %v1352_v53, %v2385_v51  ;;  %v1409_v61 = vmax.f32 %v1361_v27, 0.0 }
 0x39c   : > { %v1374_v6 = vpop.f32.mrf.mxu1  ;;  %v1345_v53 = vadd.f32 %v1344_v22, %v2391_v42  ;;  %v1335_v42 = vadd.f32 %v2409_v55, %v2395_v3  ;;  %v1807_v55 = vmov 1966171168  }
 0x39d   : > { %v1375_v39 = vadd.f32 %v1374_v6, %v2379_v57  ;;  %v1414_v34 = vmax.f32 %v1373_v38, 0.0  ;;  %v1406_v24 = vmax.f32 %v1353_v49, 0.0  ;;  %v1407_v6 = vmax.f32 %v1355_v23, 0.0 }
 0x39e   : > { %v1376_v7 = vpop.f32.mrf.mxu1  ;;  %v1403_v22 = vmax.f32 %v1345_v53, 0.0  ;;  %v1399_v36 = vmax.f32 %v1335_v42, 0.0  ;;  %v1493_v38 = vunpack.c.l.s4 %v1807_v55 }
 0x39f   : > { %v1377_v4 = vadd.f32 %v1376_v7, %v2379_v57  ;;  %v1415_v26 = vmax.f32 %v1375_v39, 0.0  ;;  %v1412_v57 = vmax.f32 %v1367_v30, 0.0  ;;  %v1432_v7 = vpack.c.bf16 %v1411_v52, %v1409_v61  ;;  %v1442_v39 = vpop.permute.xlu0 %1441 }
 0x3a0   : > { %v1380_v12 = vpop.f32.mrf.mxu1 }
 0x3a1   : > { %v1381_v40 = vadd.f32 %v1380_v12, %v2373_v46  ;;  %v1416_v32 = vmax.f32 %v1377_v4, 0.0  ;;  %v1434_v44 = vpack.c.bf16 %v1415_v26, %v1413_v9  ;;  %v1433_v58 = vpack.c.bf16 %v1412_v57, %v1410_v19 }
 0x3a2   : > { %v1382_v59 = vpop.f32.mrf.mxu1  ;;  %v1429_v4 = vpack.c.bf16 %v1404_v41, %v1402_v29 }
 0x3a3   : > { %v1383_v13 = vadd.f32 %v1382_v59, %v2373_v46  ;;  %v1417_v35 = vmax.f32 %v1381_v40, 0.0  ;;  %v1435_v11 = vpack.c.bf16 %v1416_v32, %v1414_v34 }
 0x3a4   : > { %v1384_v43 = vpop.f32.mrf.mxu1 }
 0x3a5   : > { %v1385_v15 = vadd.f32 %v1384_v43, %v2375_v48  ;;  %v1418_v17 = vmax.f32 %v1383_v13, 0.0  ;;  %v1401_v13 = vmax.f32 %v1341_v8, 0.0 }
 0x3a6   : > { %v1386_v5 = vpop.f32.mrf.mxu1 }
 0x3a7   : > { %v1387_v14 = vadd.f32 %v1386_v5, %v2375_v48  ;;  %v1419_v21 = vmax.f32 %v1385_v15, 0.0  ;;  %v1357_v48 = vadd.f32 %v1356_v33, %v2387_v2  ;;  %v1351_v33 = vadd.f32 %v1350_v31, %v2385_v51 }
 0x3a8   : > { %v1337_v2 = vadd.f32 %v2411_v28, %v2395_v3  ;;  %v1333_v51 = vadd.f32 %v2405_v37, %v2393_v0  ;;  %v1331_v28 = vadd.f32 %v2401_v54, %v2393_v0  ;;  %v1428_v15 = vpack.c.bf16 %v1403_v22, %v1401_v13  ;;  %v1421_v0 = vld [vmem:[%s2506_s7] sm:$0x1] }
 0x3a9   : > { %v1420_v18 = vmax.f32 %v1387_v14, 0.0  ;;  %v1436_v20 = vpack.c.bf16 %v1419_v21, %v1417_v35  ;;  %v1408_v45 = vmax.f32 %v1357_v48, 0.0  ;;  %v1405_v59 = vmax.f32 %v1351_v33, 0.0 }
 0x3aa   : > { %v1400_v43 = vmax.f32 %v1337_v2, 0.0  ;;  %v1398_v56 = vmax.f32 %v1333_v51, 0.0  ;;  %v1397_v40 = vmax.f32 %v1331_v28, 0.0  ;;  %v1444_v3 = vlaneseq }
 0x3ab   : > { %v1437_v46 = vpack.c.bf16 %v1420_v18, %v1418_v17  ;;  %v1431_v12 = vpack.c.bf16 %v1408_v45, %v1406_v24  ;;  %v1430_v31 = vpack.c.bf16 %v1407_v6, %v1405_v59  ;;  %v1494_v21 = vunpack.c.0.s8 %v1493_v38 }
 0x3ac   : > { %v1427_v37 = vpack.c.bf16 %v1400_v43, %v1398_v56  ;;  %v1426_v5 = vpack.c.bf16 %v1399_v36, %v1397_v40  ;;  %v1445_v54 = vshrl.u32 %v1444_v3, 7  ;;  %vm1509_vm1 = vcmp.lt.s32.totalorder %v1444_v3, 256 }
 0x3ad   : > { %1448 = vmatprep.subr.bf16.mxu0 %v1437_v46 }
 0x3ae   : > { %1449 = vmatpush1.bf16.msra.mxu0 %v1436_v20  ;;  %v1446_v14 = vsub.s32 0, %v1445_v54  ;;  %v1497_v17 = vsub.s32 %v1494_v21, %v1445_v54 }
 0x3af   : > { %1450 = vmatprep.subr.bf16.mxu0 %v1435_v11 }
 0x3b0   : > { %v1447_v30 = vrot.slane %v1442_v39, %v1446_v14 }
 0x3b2   : > { %1451 = vmatpush1.bf16.msra.mxu0 %v1434_v44 }
 0x3b3   : > { %1452 = vmatprep.subr.bf16.mxu0 %v1433_v58 }
 0x3b6   : > { %1453 = vmatpush1.bf16.msra.mxu0 %v1432_v7 }
 0x3b7   : > { %1454 = vmatprep.subr.bf16.mxu0 %v1431_v12 }
 0x3ba   : > { %1455 = vmatpush1.bf16.msra.mxu0 %v1430_v31 }
 0x3bb   : > { %1456 = vmatprep.subr.bf16.mxu0 %v1429_v4 }
 0x3be   : > { %1457 = vmatpush1.bf16.msra.mxu0 %v1428_v15 }
 0x3bf   : > { %1458 = vmatprep.subr.bf16.mxu0 %v1427_v37 }
 0x3c2   : > { %1459 = vmatpush1.bf16.msra.mxu0 %v1426_v5 }
 0x3c3   : > { %1460 = vmatprep.subr.bf16.mxu0 %v2407_v10 }
 0x3c6   : > { %1461 = vmatpush1.bf16.msra.mxu0 %v2403_v60 }
 0x3c7   : > { %1462 = vmatprep.subr.bf16.mxu0 %v2399_v16 }
 0x3ca   : > { %1463 = vmatpush1.bf16.msra.mxu0 %v2397_v1 }
 0x3cd   : > { %1481 = vmatmul.mubr.bf16.vlgmr.msra.gmra.mxu0 %v1421_v0 }
 0x48d   : > { %v1482_v10 = vpop.f32.mrf.mxu0 }
 0x48e   : > { %v1483_v32 = vadd.f32 %v1482_v10, %v1447_v30 }
 0x48f   : > { %v1484_v60 = vpop.f32.mrf.mxu0 }
 0x490   : > { %v1485_v16 = vadd.f32 %v1484_v60, %v1447_v30 }
 0x491   : > { %v1486_v1 = vpop.f32.mrf.mxu0 }
 0x492   : > { %v1491_v18 = vcombine.low %v1483_v32, %v1485_v16 }
 0x493   : > { %v1487_v62 = vpop.f32.mrf.mxu0 }
 0x494   : > { %v1498_v35 = vrot.slane %v1491_v18, %v1497_v17  ;;  %1519 = sbr.rel (!%p1900_p5) target bundleno = 1203 (0x4b3), region = 60 }
 0x496   : > { %v1505_v63 = vrot.slane %v1498_v35, %v1497_v17 }
 0x498   : > { %1511 = vst.msk [vmem:[%s340_s24] sm:$0x3] %vm1509_vm1, %v1505_v63 }
 0x499   : > { %s2516_s27 = smov (!%p1522_p11, %s1521_s27), 2 }
 0x49a   : > { %s2457_s28 = sshll.u32 %s2516_s27, 4 }
 0x49b   : > { %s1526_s29 = ssub.s32 32, %s2457_s28 }
 0x49c   : > { %1527 = vsyncadd %s2452_s25, %s1526_s29  ;;  %p1633_p12 = scmp.ne.s32.totalorder %s2457_s28, 0  ;;  %s1530_s20 = scalar_lea.hbm %s2508_s9, %s1911_s22 }
 0x49d   : > { %s1532_s10 = sshll.u32 %s340_s24, 4  ;;  %s1808_s17 = smov [#allocation3]   ;;  %s1533_s10 = int_to_ptr.vmem [resolvable:$true] %s1532_s10 }
 0x49e   : > { %s1744_s8 = scalar_lea.vmem %s1533_s10, %s2457_s28  ;;  %s1748_s18 = sshll.u32 %s1808_s17, 4  ;;  %s1749_s18 = int_to_ptr.vmem [resolvable:$false] %s1748_s18 }
 0x49f   : > { %p1745_p13 = scmp.ne.s32.totalorder %s1533_s10, %s1744_s8  ;;  %s1750_s23 = scalar_lea.vmem %s1749_s18, 64 }
 0x4a0   : > { %p1751_p2 = scmp.lt.s32.totalorder %s1533_s10, %s1749_s18  ;;  %p1752_p3 = scmp.lt.s32.totalorder %s1750_s23, %s1744_s8 }
 0x4a1   : > { %p1746_p0 = pnand %p1745_p13, %p1633_p12 }
 0x4a2   : > { %p1753_p4 = por %p1752_p3, %p1751_p2 }
 0x4a3   : > { %p1747_p1 = pneg %p1746_p0 }
 0x4a5   : > { %p1754_p5 = pnand %p1753_p4, %p1747_p1 }
 0x4a7   : > { %1757 = shalt.err (!%p1754_p5)
}
 0x4a8   : > { %s1758_s26 = scalar_lea.hbm %s1530_s20, %s2457_s28  ;;  %s1762_s27 = scalar_lea.hbm %s2508_s9, 48 }
 0x4a9   : > { %p1759_p7 = scmp.ne.s32.totalorder %s1530_s20, %s1758_s26  ;;  %p1763_p10 = scmp.lt.s32.totalorder %s1530_s20, %s2508_s9 }
 0x4aa   : > { %p1764_p11 = scmp.lt.s32.totalorder %s1762_s27, %s1758_s26 }
 0x4ab   : > { %p1760_p8 = pnand %p1759_p7, %p1633_p12 }
 0x4ac   : > { %p1765_p13 = por %p1764_p11, %p1763_p10 }
 0x4ad   : > { %p1761_p9 = pneg %p1760_p8 }
 0x4af   : > { %p1766_p0 = pnand %p1765_p13, %p1761_p9 }
 0x4b1   : > { %1769 = shalt.err (!%p1766_p0)
}
 0x4b2   : > { %1535 = dma.vmem_to_hbm [thread:$0]  (%p1633_p12), %s1533_s10, %s2457_s28, %s1530_s20, %s2452_s25  }
 0x4b3 PF: > { %p1683_p1 = scmp.ge.s32.totalorder %s1804_s14, 2  ;;  %s1544_s15 = sand.u32 1, %s1792_s11  }
 0x4b4   : > { %s1545_s8 = scalar_lea.sflag [#allocation4], %s1544_s15 }
 0x4b5   : > { %p1680_p2 = pnand %p1683_p1, %p1904_p6 }
 0x4b7   : > { %p1681_p3 = pneg %p1680_p2 }
 0x4b9   : > { %1787 = dma.done.wait (%p1681_p3), %s1545_s8, 32  }
 0x4ba   : > { %1789 = vsyncadd (%p1681_p3), %s1545_s8, 4294967264  ;;  %p21_p4 = scmp.ge.s32.totalorder %s1887_s16, 4   ;;  %s2511_s11 = smov %s1796_s12 }
 0x4bb   : > { %s2512_s12 = smov %s1800_s13  ;;  %s2513_s13 = smov %s1898_s19 }
 0x4bc   : > { %s2514_s14 = smov %s1887_s16  ;;  %23 = sbr.rel (!%p21_p4) target bundleno = 6 (0x6), region = 91 }
 0x4c1   :  { %1550 = vsyncpa [#allocation4], 1 }
 0x4c2   :  { %1552 = vsyncpa [#allocation4 + $0x1], 1 }

</bundles_post_ra>
